<compile_context>
chip_gen: v5e
topology: v5e:2x2
jax: 0.10.0
libtpu: 0.0.40
codegen_flags: <defaults>
</compile_context>

<pallas_src>
import functools

import jax
import jax.numpy as jnp
from jax import lax
from jax.experimental import pallas as pl
from jax.experimental.pallas import tpu as pltpu

EPS = 1e-5  # RMSNorm epsilon
MASK_VALUE = -1e30  # finite mask value: avoids exp(-inf - -inf) NaNs when tiling KV


def _gelu_tanh(x):
    # GPT-2 style tanh-approximated GELU
    c = jnp.sqrt(2.0 / jnp.pi).astype(x.dtype)
    return 0.5 * x * (1.0 + jnp.tanh(c * (x + 0.044715 * x * x * x)))


def _pick_tile(n, target, quantum):
    """Largest divisor of n that is <= target and a multiple of `quantum` (or n itself)."""
    for d in range(min(n, target), 0, -1):
        if n % d == 0 and (d % quantum == 0 or d == n):
            return d
    return n


def _sq():
    """Squeezed block dim (size-1 leading dim removed from the kernel Ref)."""
    return pl.Squeezed() if hasattr(pl, "Squeezed") else None


# ---------------------------------------------------------------------------
# Single-buffering probe for grid-invariant (weight) blocks.
# ---------------------------------------------------------------------------
_BUFFERED1_OK = None


def _buffered1_supported():
    """Check once whether BlockSpec(pipeline_mode=pl.Buffered(1)) works on this jax/TPU."""
    global _BUFFERED1_OK
    if _BUFFERED1_OK is None:
        def _copy(x_ref, o_ref):
            o_ref[...] = x_ref[...]
        try:
            x = jnp.zeros((8, 128), jnp.float32)
            out = pl.pallas_call(
                _copy,
                out_shape=jax.ShapeDtypeStruct((16, 128), jnp.float32),
                grid=(2,),
                in_specs=[pl.BlockSpec((8, 128), lambda i: (0, 0),
                                       pipeline_mode=pl.Buffered(1))],
                out_specs=pl.BlockSpec((8, 128), lambda i: (i, 0)),
            )(x)
            jax.block_until_ready(out)
            _BUFFERED1_OK = True
        except Exception:
            _BUFFERED1_OK = False
    return _BUFFERED1_OK


def _const_spec(shape, grid_rank):
    """BlockSpec for a grid-invariant operand; single-buffered (halves its VMEM) when possible."""
    ndim = len(shape)
    if grid_rank == 1:
        idx = lambda i: (0,) * ndim
    elif grid_rank == 2:
        idx = lambda i, j: (0,) * ndim
    else:
        idx = lambda i, j, k: (0,) * ndim
    if _buffered1_supported():
        return pl.BlockSpec(shape, idx, pipeline_mode=pl.Buffered(1))
    return pl.BlockSpec(shape, idx)


def _compiler_params(dimension_semantics, est_bytes):
    # Explicit scoped-VMEM limit (v5e default is only 16 MiB); 2x headroom over the
    # estimated working set, floored at 32 MiB, capped well below physical VMEM.
    limit = int(min(100 * 2**20, max(32 * 2**20, 2 * est_bytes)))
    return pltpu.CompilerParams(dimension_semantics=dimension_semantics,
                                vmem_limit_bytes=limit)


# ---------------------------------------------------------------------------
# Kernel 1: RMSNorm1 + Q/K/V projection (row-tiled, bf16 MXU / f32 accumulate)
# ---------------------------------------------------------------------------
def _rmsnorm_qkv_kernel(x_ref, wq_ref, bq_ref, wk_ref, bk_ref, wv_ref, bv_ref,
                        g1_ref, q_ref, k_ref, v_ref, *, inv_sqrt_hd):
    x = x_ref[...].astype(jnp.float32)                      # (TM, D)
    ms = jnp.mean(x * x, axis=-1, keepdims=True)            # f32 statistics
    xn = (x * lax.rsqrt(ms + EPS) * g1_ref[...]).astype(jnp.bfloat16)

    q = jnp.dot(xn, wq_ref[...], preferred_element_type=jnp.float32) + bq_ref[...]
    # fold 1/sqrt(head_dim) into q once (S*D mults) instead of scaling H*S*S scores
    q_ref[...] = (q * inv_sqrt_hd).astype(q_ref.dtype)
    k = jnp.dot(xn, wk_ref[...], preferred_element_type=jnp.float32) + bk_ref[...]
    k_ref[...] = k.astype(k_ref.dtype)
    v = jnp.dot(xn, wv_ref[...], preferred_element_type=jnp.float32) + bv_ref[...]
    v_ref[...] = v.astype(v_ref.dtype)


def _rmsnorm_qkv(x2, wq, bq, wk, bk, wv, bv, g1, *, inv_sqrt_hd, tm):
    rows, D = x2.shape
    n_m = rows // tm
    row_spec = pl.BlockSpec((tm, D), lambda m: (m, 0))
    wbuf = 1 if _buffered1_supported() else 2
    est = (2 * tm * D * 4                       # x tile (f32, double-buffered)
           + 3 * 2 * tm * D * 2                 # q/k/v tiles (bf16, double-buffered)
           + wbuf * (3 * D * D * 2 + 4 * D * 4))  # weights (bf16) + biases + g1
    kernel = functools.partial(_rmsnorm_qkv_kernel, inv_sqrt_hd=inv_sqrt_hd)
    return pl.pallas_call(
        kernel,
        out_shape=tuple(jax.ShapeDtypeStruct((rows, D), jnp.bfloat16) for _ in range(3)),
        grid_spec=pltpu.PrefetchScalarGridSpec(
            num_scalar_prefetch=0,
            grid=(n_m,),
            in_specs=[
                row_spec,
                _const_spec((D, D), 1), _const_spec((1, D), 1),   # wq, bq
                _const_spec((D, D), 1), _const_spec((1, D), 1),   # wk, bk
                _const_spec((D, D), 1), _const_spec((1, D), 1),   # wv, bv
                _const_spec((1, D), 1),                           # g1
            ],
            out_specs=[row_spec, row_spec, row_spec],
        ),
        compiler_params=_compiler_params(("parallel",), est),
    )(x2, wq, bq, wk, bk, wv, bv, g1)


# ---------------------------------------------------------------------------
# Kernel 2: causal flash attention (online softmax, per-head grid axis)
# ---------------------------------------------------------------------------
def _flash_attn_kernel(q_ref, k_ref, v_ref, o_ref, m_scr, l_scr, acc_scr, *, tq, tk):
    qi = pl.program_id(1)
    ki = pl.program_id(2)

    @pl.when(ki == 0)
    def _init():
        m_scr[...] = jnp.full(m_scr.shape, -jnp.inf, m_scr.dtype)
        l_scr[...] = jnp.zeros(l_scr.shape, l_scr.dtype)
        acc_scr[...] = jnp.zeros(acc_scr.shape, acc_scr.dtype)

    q_start = qi * tq
    k_start = ki * tk

    # Causal block skip: KV tiles entirely above the diagonal contribute nothing.
    @pl.when(k_start <= q_start + (tq - 1))
    def _compute():
        q = q_ref[...]                                   # (TQ, HD) bf16, pre-scaled by 1/sqrt(HD)
        k = k_ref[...]                                   # (TK, HD) bf16
        s = lax.dot_general(q, k, (((1,), (1,)), ((), ())),
                            preferred_element_type=jnp.float32)   # (TQ, TK) f32
        row = q_start + lax.broadcasted_iota(jnp.int32, (tq, tk), 0)
        col = k_start + lax.broadcasted_iota(jnp.int32, (tq, tk), 1)
        s = jnp.where(col > row, MASK_VALUE, s)

        m_prev = m_scr[...]
        m_new = jnp.maximum(m_prev, jnp.max(s, axis=-1, keepdims=True))
        alpha = jnp.exp(m_prev - m_new)
        p = jnp.exp(s - m_new)
        l_scr[...] = alpha * l_scr[...] + jnp.sum(p, axis=-1, keepdims=True)
        acc_scr[...] = alpha * acc_scr[...] + jnp.dot(
            p.astype(v_ref.dtype), v_ref[...], preferred_element_type=jnp.float32)
        m_scr[...] = m_new

    @pl.when(ki == pl.num_programs(2) - 1)
    def _finalize():
        inv_l = pl.reciprocal(l_scr[...], approx=True)   # EUP slot; deferred normalization
        o_ref[...] = (acc_scr[...] * inv_l).astype(o_ref.dtype)


def _flash_attention(qh, kh, vh, *, tq, tk):
    BH, S, HD = qh.shape
    n_q, n_kv = S // tq, S // tk
    q_spec = pl.BlockSpec((_sq(), tq, HD), lambda bh, qi, ki: (bh, qi, 0))
    kv_spec = pl.BlockSpec((_sq(), tk, HD), lambda bh, qi, ki: (bh, ki, 0))
    o_spec = pl.BlockSpec((_sq(), tq, HD), lambda bh, qi, ki: (bh, qi, 0))
    est = (2 * (tq + 2 * tk) * HD * 2           # q/k/v tiles (bf16, double-buffered)
           + 2 * tq * HD * 2                    # output tile
           + (2 * tq * 128 + tq * max(HD, 128)) * 4   # m/l/acc scratch (lane-padded)
           + 4 * tq * tk * 4)                   # score / p temporaries headroom
    kernel = functools.partial(_flash_attn_kernel, tq=tq, tk=tk)
    return pl.pallas_call(
        kernel,
        out_shape=jax.ShapeDtypeStruct((BH, S, HD), jnp.bfloat16),
        grid_spec=pltpu.PrefetchScalarGridSpec(
            num_scalar_prefetch=0,
            grid=(BH, n_q, n_kv),
            in_specs=[q_spec, kv_spec, kv_spec],
            out_specs=o_spec,
            scratch_shapes=[
                pltpu.VMEM((tq, 1), jnp.float32),    # running max
                pltpu.VMEM((tq, 1), jnp.float32),    # running sum
                pltpu.VMEM((tq, HD), jnp.float32),   # un-normalized context accumulator
            ],
        ),
        compiler_params=_compiler_params(("parallel", "parallel", "arbitrary"), est),
    )(qh, kh, vh)


# ---------------------------------------------------------------------------
# Kernel 3: output projection + residual + RMSNorm2 + FFN (Dff-tiled) + residual
# ---------------------------------------------------------------------------
def _out_proj_ffn_kernel(ctx_ref, x_ref, wo_ref, bo_ref, g2_ref,
                         w1_ref, b1_ref, w2_ref, b2_ref, o_ref,
                         x1_scr, xn2_scr, acc_scr):
    f = pl.program_id(1)

    @pl.when(f == 0)
    def _prologue():
        attn = jnp.dot(ctx_ref[...], wo_ref[...],
                       preferred_element_type=jnp.float32) + bo_ref[...]
        x1 = x_ref[...].astype(jnp.float32) + attn          # residual 1 (dropout = identity)
        x1_scr[...] = x1
        ms = jnp.mean(x1 * x1, axis=-1, keepdims=True)
        xn2_scr[...] = (x1 * lax.rsqrt(ms + EPS) * g2_ref[...]).astype(xn2_scr.dtype)
        acc_scr[...] = jnp.zeros(acc_scr.shape, acc_scr.dtype)

    # One Dff chunk of the FFN per grid step; accumulate the second matmul in f32.
    h = jnp.dot(xn2_scr[...], w1_ref[...],
                preferred_element_type=jnp.float32) + b1_ref[...]
    h = _gelu_tanh(h)
    acc_scr[...] += jnp.dot(h.astype(jnp.bfloat16), w2_ref[...],
                            preferred_element_type=jnp.float32)

    @pl.when(f == pl.num_programs(1) - 1)
    def _epilogue():
        o_ref[...] = (x1_scr[...] + acc_scr[...] + b2_ref[...]).astype(o_ref.dtype)


def _out_proj_ffn(ctx2, x2, wo, bo, g2, w1, b1, w2, b2, *, tm, tff):
    rows, D = x2.shape
    Dff = w1.shape[1]
    n_m, n_f = rows // tm, Dff // tff
    wbuf = 1 if _buffered1_supported() else 2
    est = (2 * tm * D * (2 + 4 + 4)                       # ctx(bf16) + x(f32) in, out(f32)
           + wbuf * (D * D * 2 + 3 * D * 4)               # wo / bo / g2 / b2 (grid-invariant)
           + 2 * (D * tff * 2 + tff * 4 + tff * D * 2)    # w1/b1/w2 Dff tiles (double-buffered)
           + tm * (D * 4 + D * 2 + D * 4)                 # x1 / xn2 / acc scratch
           + 2 * tm * tff * 4)                            # h temporary headroom
    return pl.pallas_call(
        _out_proj_ffn_kernel,
        out_shape=jax.ShapeDtypeStruct((rows, D), x2.dtype),
        grid_spec=pltpu.PrefetchScalarGridSpec(
            num_scalar_prefetch=0,
            grid=(n_m, n_f),
            in_specs=[
                pl.BlockSpec((tm, D), lambda m, f: (m, 0)),     # ctx (attention output)
                pl.BlockSpec((tm, D), lambda m, f: (m, 0)),     # x (residual)
                _const_spec((D, D), 2),                         # wo
                _const_spec((1, D), 2),                         # bo
                _const_spec((1, D), 2),                         # g2
                pl.BlockSpec((D, tff), lambda m, f: (0, f)),    # w1 Dff tile
                pl.BlockSpec((1, tff), lambda m, f: (0, f)),    # b1 Dff tile
                pl.BlockSpec((tff, D), lambda m, f: (f, 0)),    # w2 Dff tile
                _const_spec((1, D), 2),                         # b2
            ],
            out_specs=pl.BlockSpec((tm, D), lambda m, f: (m, 0)),
            scratch_shapes=[
                pltpu.VMEM((tm, D), jnp.float32),    # x1 (residual-1 result)
                pltpu.VMEM((tm, D), jnp.bfloat16),   # normalized x1 (MXU operand)
                pltpu.VMEM((tm, D), jnp.float32),    # FFN output accumulator
            ],
        ),
        compiler_params=_compiler_params(("parallel", "arbitrary"), est),
    )(ctx2, x2, wo, bo, g2, w1, b1, w2, b2)


# ---------------------------------------------------------------------------
# Wrapper: full transformer block
# ---------------------------------------------------------------------------
def transformer_block(x, params, *, num_heads):
    B, S, D = x.shape
    assert D % num_heads == 0, "embedding_dim must be divisible by num_heads"
    HD = D // num_heads
    Dff = params['w1'].shape[1]
    rows = B * S

    # Tile sizes: big enough to amortize per-step overhead, sized/aligned for the
    # (8,128) vreg tiling and 256-wide MXU where the problem allows it.
    tm = _pick_tile(rows, 256, 8)       # row tile for QKV / FFN kernels
    tq = _pick_tile(S, 128, 8)          # flash-attention query tile
    tk = _pick_tile(S, 256, 8)          # flash-attention key/value tile
    tff = _pick_tile(Dff, 512, 256)     # FFN hidden-dim tile (256-aligned for v6e/v7x MXU)

    # bf16 weights: full-rate MXU and half the weight DMA bytes; f32 accumulation in-kernel.
    bf = lambda a: a.astype(jnp.bfloat16)
    x2 = x.reshape(rows, D)

    q2, k2, v2 = _rmsnorm_qkv(
        x2, bf(params['wq']), params['bq'], bf(params['wk']), params['bk'],
        bf(params['wv']), params['bv'], params['g1'],
        inv_sqrt_hd=1.0 / float(HD) ** 0.5, tm=tm)

    # (rows, D) -> (B*H, S, HD): head becomes a grid axis so attention runs as
    # lane-dense 2-D MXU tiles instead of a 3-D einsum with a tiny minor dim.
    def to_heads(t):
        return t.reshape(B, S, num_heads, HD).transpose(0, 2, 1, 3).reshape(
            B * num_heads, S, HD)

    ctx = _flash_attention(to_heads(q2), to_heads(k2), to_heads(v2), tq=tq, tk=tk)
    ctx2 = ctx.reshape(B, num_heads, S, HD).transpose(0, 2, 1, 3).reshape(rows, D)

    out2 = _out_proj_ffn(ctx2, x2, bf(params['wo']), params['bo'], params['g2'],
                         bf(params['w1']), params['b1'], bf(params['w2']), params['b2'],
                         tm=tm, tff=tff)
    return out2.reshape(B, S, D)


# ---------------- pure-JAX (f32) reference for verification ----------------
def transformer_block_ref(x, params, *, num_heads):
    B, S, D = x.shape
    HD = D // num_heads

    def rmsnorm(z, g):
        return z * lax.rsqrt(jnp.mean(z * z, axis=-1, keepdims=True) + EPS) * g

    xn = rmsnorm(x, params['g1'])
    q = xn @ params['wq'] + params['bq']
    k = xn @ params['wk'] + params['bk']
    v = xn @ params['wv'] + params['bv']
    qh = q.reshape(B, S, num_heads, HD)
    kh = k.reshape(B, S, num_heads, HD)
    vh = v.reshape(B, S, num_heads, HD)
    scores = jnp.einsum('bqhd,bkhd->bhqk', qh, kh) / jnp.sqrt(jnp.float32(HD))
    causal = jnp.triu(jnp.ones((S, S), bool), k=1)
    scores = jnp.where(causal[None, None], -jnp.inf, scores)
    p = jax.nn.softmax(scores, axis=-1)
    ctx = jnp.einsum('bhqk,bkhd->bqhd', p, vh).reshape(B, S, D)
    attn = ctx @ params['wo'] + params['bo']
    x1 = x + attn

    xn2 = rmsnorm(x1, params['g2'])
    h = _gelu_tanh(xn2 @ params['w1'] + params['b1'])
    y = h @ params['w2'] + params['b2']
    return x1 + y


def init_params(key, d_model, d_ff):
    ks = jax.random.split(key, 8)
    s = 0.02
    return {
        'wq': s * jax.random.normal(ks[0], (d_model, d_model), jnp.float32),
        'bq': jnp.zeros((1, d_model), jnp.float32),
        'wk': s * jax.random.normal(ks[1], (d_model, d_model), jnp.float32),
        'bk': jnp.zeros((1, d_model), jnp.float32),
        'wv': s * jax.random.normal(ks[2], (d_model, d_model), jnp.float32),
        'bv': jnp.zeros((1, d_model), jnp.float32),
        'wo': s * jax.random.normal(ks[3], (d_model, d_model), jnp.float32),
        'bo': jnp.zeros((1, d_model), jnp.float32),
        'g1': jnp.ones((1, d_model), jnp.float32),
        'g2': jnp.ones((1, d_model), jnp.float32),
        'w1': s * jax.random.normal(ks[4], (d_model, d_ff), jnp.float32),
        'b1': 0.01 * jax.random.normal(ks[5], (1, d_ff), jnp.float32),
        'w2': s * jax.random.normal(ks[6], (d_ff, d_model), jnp.float32),
        'b2': 0.01 * jax.random.normal(ks[7], (1, d_model), jnp.float32),
    }


if __name__ == "__main__":
    cfg = dict(embedding_dim=32, num_heads=4, context_length=8,
               drop_rate=0.0, qkv_bias=True)
    B, S, D = 2, cfg['context_length'], cfg['embedding_dim']
    D_FF = 4 * D

    key = jax.random.PRNGKey(0)
    kx, kp = jax.random.split(key)
    x = jax.random.normal(kx, (B, S, D), jnp.float32)
    params = init_params(kp, D, D_FF)

    out = transformer_block(x, params, num_heads=cfg['num_heads'])
    out = jax.block_until_ready(out)

    ref = transformer_block_ref(x, params, num_heads=cfg['num_heads'])
    assert out.shape == (B, S, D)
    # bf16 MXU operands (f32 accumulation) -> compare against the f32 reference
    # with a mixed-precision-appropriate tolerance.
    err = float(jnp.max(jnp.abs(out - ref)))
    assert jnp.allclose(out, ref, atol=2e-2, rtol=2e-2), f"max abs err = {err}"

    print("KERNEL_OK")
</pallas_src>

<mosaic_0001>
module attributes {stable_mosaic.version = 11 : i64} {
  func.func @_copy(%arg0: i32, %arg1: memref<8x128xf32, #tpu.memory_space<vmem>>, %arg2: memref<8x128xf32, #tpu.memory_space<vmem>>) attributes {dimension_semantics = [#tpu.dimension_semantics<arbitrary>], iteration_bounds = array<i64: 2>, scalar_prefetch = 0 : i64, scratch_operands = 0 : i64, tpu.core_type = #tpu.core_type<tc>, window_params = [{pipeline_mode = #tpu.pipeline_mode<synchronous>, transform_indices = @transform_0, window_bounds = array<i64: 8, 128>}, {transform_indices = @transform_1, window_bounds = array<i64: 8, 128>}]} {
    %c0 = arith.constant 0 : index
    %c0_0 = arith.constant 0 : index
    %0 = vector.load %arg1[%c0, %c0_0] : memref<8x128xf32, #tpu.memory_space<vmem>>, vector<8x128xf32>
    %c0_1 = arith.constant 0 : index
    %c0_2 = arith.constant 0 : index
    %1 = vector.load %arg2[%c0_1, %c0_2] : memref<8x128xf32, #tpu.memory_space<vmem>>, vector<8x128xf32>
    tpu.vector_store %arg2[%c0_1, %c0_2], %0 {strides = array<i32>} : memref<8x128xf32, #tpu.memory_space<vmem>>, vector<8x128xf32>,
    return
  }
  func.func @transform_0(%arg0: i32) -> (i32, i32) {
    %c0_i32 = arith.constant 0 : i32
    %c0_i32_0 = arith.constant 0 : i32
    %c0_i32_1 = arith.constant 0 : i32
    return %c0_i32, %c0_i32_0 : i32, i32
  }
  func.func @transform_1(%arg0: i32) -> (i32, i32) {
    %c0_i32 = arith.constant 0 : i32
    %c0_i32_0 = arith.constant 0 : i32
    return %arg0, %c0_i32 : i32, i32
  }
}

module attributes {stable_mosaic.version = 11 : i64} {
  func.func @_rmsnorm_qkv_kernel(%arg0: i32, %arg1: memref<16x32xf32, #tpu.memory_space<vmem>>, %arg2: memref<32x32xbf16, #tpu.memory_space<vmem>>, %arg3: memref<1x32xf32, #tpu.memory_space<vmem>>, %arg4: memref<32x32xbf16, #tpu.memory_space<vmem>>, %arg5: memref<1x32xf32, #tpu.memory_space<vmem>>, %arg6: memref<32x32xbf16, #tpu.memory_space<vmem>>, %arg7: memref<1x32xf32, #tpu.memory_space<vmem>>, %arg8: memref<1x32xf32, #tpu.memory_space<vmem>>, %arg9: memref<16x32xbf16, #tpu.memory_space<vmem>>, %arg10: memref<16x32xbf16, #tpu.memory_space<vmem>>, %arg11: memref<16x32xbf16, #tpu.memory_space<vmem>>) attributes {dimension_semantics = [#tpu.dimension_semantics<parallel>], iteration_bounds = array<i64: 1>, scalar_prefetch = 0 : i64, scratch_operands = 0 : i64, tpu.core_type = #tpu.core_type<tc>, window_params = [{transform_indices = @transform_0, window_bounds = array<i64: 16, 32>}, {pipeline_mode = #tpu.pipeline_mode<synchronous>, transform_indices = @transform_1, window_bounds = array<i64: 32, 32>}, {pipeline_mode = #tpu.pipeline_mode<synchronous>, transform_indices = @transform_2, window_bounds = array<i64: 1, 32>}, {pipeline_mode = #tpu.pipeline_mode<synchronous>, transform_indices = @transform_3, window_bounds = array<i64: 32, 32>}, {pipeline_mode = #tpu.pipeline_mode<synchronous>, transform_indices = @transform_4, window_bounds = array<i64: 1, 32>}, {pipeline_mode = #tpu.pipeline_mode<synchronous>, transform_indices = @transform_5, window_bounds = array<i64: 32, 32>}, {pipeline_mode = #tpu.pipeline_mode<synchronous>, transform_indices = @transform_6, window_bounds = array<i64: 1, 32>}, {pipeline_mode = #tpu.pipeline_mode<synchronous>, transform_indices = @transform_7, window_bounds = array<i64: 1, 32>}, {transform_indices = @transform_8, window_bounds = array<i64: 16, 32>}, {transform_indices = @transform_9, window_bounds = array<i64: 16, 32>}, {transform_indices = @transform_10, window_bounds = array<i64: 16, 32>}]} {
    %c0 = arith.constant 0 : index
    %c0_0 = arith.constant 0 : index
    %0 = vector.load %arg1[%c0, %c0_0] : memref<16x32xf32, #tpu.memory_space<vmem>>, vector<16x32xf32>
    %1 = arith.mulf %0, %0 : vector<16x32xf32>
    %cst = arith.constant dense<0.000000e+00> : vector<16xf32>
    %2 = vector.multi_reduction <add>, %1, %cst [1] : vector<16x32xf32> to vector<16xf32>
    %3 = vector.shape_cast %2 : vector<16xf32> to vector<16x1xf32>
    %cst_1 = arith.constant 3.200000e+01 : f32
    %4 = vector.broadcast %cst_1 : f32 to vector<16x1xf32>
    %5 = arith.divf %3, %4 : vector<16x1xf32>
    %cst_2 = arith.constant 9.99999974E-6 : f32
    %6 = vector.broadcast %cst_2 : f32 to vector<16x1xf32>
    %7 = arith.addf %5, %6 : vector<16x1xf32>
    %8 = math.rsqrt %7 : vector<16x1xf32>
    %9 = vector.broadcast %8 : vector<16x1xf32> to vector<16x32xf32>
    %10 = arith.mulf %0, %9 : vector<16x32xf32>
    %c0_3 = arith.constant 0 : index
    %c0_4 = arith.constant 0 : index
    %11 = vector.load %arg8[%c0_3, %c0_4] : memref<1x32xf32, #tpu.memory_space<vmem>>, vector<1x32xf32>
    %12 = vector.broadcast %11 : vector<1x32xf32> to vector<16x32xf32>
    %13 = arith.mulf %10, %12 : vector<16x32xf32>
    %14 = arith.truncf %13 : vector<16x32xf32> to vector<16x32xbf16>
    %c0_5 = arith.constant 0 : index
    %c0_6 = arith.constant 0 : index
    %15 = vector.load %arg2[%c0_5, %c0_6] : memref<32x32xbf16, #tpu.memory_space<vmem>>, vector<32x32xbf16>
    %cst_7 = arith.constant dense<0.000000e+00> : vector<16x32xf32>
    %16 = tpu.matmul %14, %15, %cst_7 {dimension_numbers = #tpu.dot_dimension_numbers<[1], [0], [0], [1], [0, 0, 1, 1], [], []>} : vector<16x32xbf16>, vector<32x32xbf16>, vector<16x32xf32> -> vector<16x32xf32>
    %c0_8 = arith.constant 0 : index
    %c0_9 = arith.constant 0 : index
    %17 = vector.load %arg3[%c0_8, %c0_9] : memref<1x32xf32, #tpu.memory_space<vmem>>, vector<1x32xf32>
    %18 = vector.broadcast %17 : vector<1x32xf32> to vector<16x32xf32>
    %19 = arith.addf %16, %18 : vector<16x32xf32>
    %cst_10 = arith.constant 0.353553385 : f32
    %20 = vector.broadcast %cst_10 : f32 to vector<16x32xf32>
    %21 = arith.mulf %19, %20 : vector<16x32xf32>
    %22 = arith.truncf %21 : vector<16x32xf32> to vector<16x32xbf16>
    %c0_11 = arith.constant 0 : index
    %c0_12 = arith.constant 0 : index
    %23 = vector.load %arg9[%c0_11, %c0_12] : memref<16x32xbf16, #tpu.memory_space<vmem>>, vector<16x32xbf16>
    tpu.vector_store %arg9[%c0_11, %c0_12], %22 {strides = array<i32>} : memref<16x32xbf16, #tpu.memory_space<vmem>>, vector<16x32xbf16>,
    %c0_13 = arith.constant 0 : index
    %c0_14 = arith.constant 0 : index
    %24 = vector.load %arg4[%c0_13, %c0_14] : memref<32x32xbf16, #tpu.memory_space<vmem>>, vector<32x32xbf16>
    %cst_15 = arith.constant dense<0.000000e+00> : vector<16x32xf32>
    %25 = tpu.matmul %14, %24, %cst_15 {dimension_numbers = #tpu.dot_dimension_numbers<[1], [0], [0], [1], [0, 0, 1, 1], [], []>} : vector<16x32xbf16>, vector<32x32xbf16>, vector<16x32xf32> -> vector<16x32xf32>
    %c0_16 = arith.constant 0 : index
    %c0_17 = arith.constant 0 : index
    %26 = vector.load %arg5[%c0_16, %c0_17] : memref<1x32xf32, #tpu.memory_space<vmem>>, vector<1x32xf32>
    %27 = vector.broadcast %26 : vector<1x32xf32> to vector<16x32xf32>
    %28 = arith.addf %25, %27 : vector<16x32xf32>
    %29 = arith.truncf %28 : vector<16x32xf32> to vector<16x32xbf16>
    %c0_18 = arith.constant 0 : index
    %c0_19 = arith.constant 0 : index
    %30 = vector.load %arg10[%c0_18, %c0_19] : memref<16x32xbf16, #tpu.memory_space<vmem>>, vector<16x32xbf16>
    tpu.vector_store %arg10[%c0_18, %c0_19], %29 {strides = array<i32>} : memref<16x32xbf16, #tpu.memory_space<vmem>>, vector<16x32xbf16>,
    %c0_20 = arith.constant 0 : index
    %c0_21 = arith.constant 0 : index
    %31 = vector.load %arg6[%c0_20, %c0_21] : memref<32x32xbf16, #tpu.memory_space<vmem>>, vector<32x32xbf16>
    %cst_22 = arith.constant dense<0.000000e+00> : vector<16x32xf32>
    %32 = tpu.matmul %14, %31, %cst_22 {dimension_numbers = #tpu.dot_dimension_numbers<[1], [0], [0], [1], [0, 0, 1, 1], [], []>} : vector<16x32xbf16>, vector<32x32xbf16>, vector<16x32xf32> -> vector<16x32xf32>
    %c0_23 = arith.constant 0 : index
    %c0_24 = arith.constant 0 : index
    %33 = vector.load %arg7[%c0_23, %c0_24] : memref<1x32xf32, #tpu.memory_space<vmem>>, vector<1x32xf32>
    %34 = vector.broadcast %33 : vector<1x32xf32> to vector<16x32xf32>
    %35 = arith.addf %32, %34 : vector<16x32xf32>
    %36 = arith.truncf %35 : vector<16x32xf32> to vector<16x32xbf16>
    %c0_25 = arith.constant 0 : index
    %c0_26 = arith.constant 0 : index
    %37 = vector.load %arg11[%c0_25, %c0_26] : memref<16x32xbf16, #tpu.memory_space<vmem>>, vector<16x32xbf16>
    tpu.vector_store %arg11[%c0_25, %c0_26], %36 {strides = array<i32>} : memref<16x32xbf16, #tpu.memory_space<vmem>>, vector<16x32xbf16>,
    return
  }
  func.func @transform_0(%arg0: i32) -> (i32, i32) {
    %c0_i32 = arith.constant 0 : i32
    %c0_i32_0 = arith.constant 0 : i32
    return %arg0, %c0_i32 : i32, i32
  }
  func.func @transform_1(%arg0: i32) -> (i32, i32) {
    %c0_i32 = arith.constant 0 : i32
    %c0_i32_0 = arith.constant 0 : i32
    %c0_i32_1 = arith.constant 0 : i32
    return %c0_i32, %c0_i32_0 : i32, i32
  }
  func.func @transform_2(%arg0: i32) -> (i32, i32) {
    %c0_i32 = arith.constant 0 : i32
    %c0_i32_0 = arith.constant 0 : i32
    %c0_i32_1 = arith.constant 0 : i32
    return %c0_i32, %c0_i32_0 : i32, i32
  }
  func.func @transform_3(%arg0: i32) -> (i32, i32) {
    %c0_i32 = arith.constant 0 : i32
    %c0_i32_0 = arith.constant 0 : i32
    %c0_i32_1 = arith.constant 0 : i32
    return %c0_i32, %c0_i32_0 : i32, i32
  }
  func.func @transform_4(%arg0: i32) -> (i32, i32) {
    %c0_i32 = arith.constant 0 : i32
    %c0_i32_0 = arith.constant 0 : i32
    %c0_i32_1 = arith.constant 0 : i32
    return %c0_i32, %c0_i32_0 : i32, i32
  }
  func.func @transform_5(%arg0: i32) -> (i32, i32) {
    %c0_i32 = arith.constant 0 : i32
    %c0_i32_0 = arith.constant 0 : i32
    %c0_i32_1 = arith.constant 0 : i32
    return %c0_i32, %c0_i32_0 : i32, i32
  }
  func.func @transform_6(%arg0: i32) -> (i32, i32) {
    %c0_i32 = arith.constant 0 : i32
    %c0_i32_0 = arith.constant 0 : i32
    %c0_i32_1 = arith.constant 0 : i32
    return %c0_i32, %c0_i32_0 : i32, i32
  }
  func.func @transform_7(%arg0: i32) -> (i32, i32) {
    %c0_i32 = arith.constant 0 : i32
    %c0_i32_0 = arith.constant 0 : i32
    %c0_i32_1 = arith.constant 0 : i32
    return %c0_i32, %c0_i32_0 : i32, i32
  }
  func.func @transform_8(%arg0: i32) -> (i32, i32) {
    %c0_i32 = arith.constant 0 : i32
    %c0_i32_0 = arith.constant 0 : i32
    return %arg0, %c0_i32 : i32, i32
  }
  func.func @transform_9(%arg0: i32) -> (i32, i32) {
    %c0_i32 = arith.constant 0 : i32
    %c0_i32_0 = arith.constant 0 : i32
    return %arg0, %c0_i32 : i32, i32
  }
  func.func @transform_10(%arg0: i32) -> (i32, i32) {
    %c0_i32 = arith.constant 0 : i32
    %c0_i32_0 = arith.constant 0 : i32
    return %arg0, %c0_i32 : i32, i32
  }
}

</mosaic_0001>

<bundles_post_ra>
// kernel: tpu_custom_call.1
= control target key start
LH: loop header
LB: loop body
LE: loop exit
PB: predicated region body
PF: predicated region fallthrough
CT: control target
= control target key end

     0   :  { %6 = vsyncpa [#allocation3], 0  ;;  %s440_s0 = inlined_call_operand.hbm [shape: f32[8,128], index: 0, kind: input, shape index: {}]   ;;  %s441_s1 = inlined_call_operand.hbm [shape: f32[16,128], index: 1, kind: output, shape index: {}]  }
   0x1   :  { %7 = vsyncpa [#allocation4], 0 }
   0x2   :  { %9 = vsyncpa [#allocation4 + $0x1], 0  ;;  %s356_s6 = smov 0   ;;  %s358_s7 = smov 0  }
   0x3   :  { %s360_s8 = smov 0   ;;  %s362_s9 = smov 0  }
   0x4 LB: > { %s377_s10 = sadd.s32 4294967295, %s343_s9   ;;  %s187_s11 = sadd.s32 4294967294, %s343_s9   ;;  %s343_s9 = sphi %s362_s9, %s447_s9   ;;  %s339_s8 = sphi %s360_s8, %s446_s8   ;;  %s335_s7 = sphi %s358_s7, %s445_s7   ;;  %s331_s6 = sphi %s356_s6, %s444_s6  }
   0x5   : > { %s381_s12 = sadd.s32 1, %s343_s9   ;;  %s43_s13 = sadd.s32 1, %s339_s8 }
   0x6   : > { %s40_s14 = ssub.s32 %s343_s9, %s381_s12  ;;  %p53_p0 = scmp.ne.s32.totalorder %s339_s8, %s335_s7 }
   0x7   : > { %p41_p1 = scmp.eq.s32.totalorder %s40_s14, 0  ;;  %p54_p2 = scmp.eq.s32.totalorder %s377_s10, 1 }
   0x8   : > { %p59_p3 = scmp.ne.s32.totalorder %s335_s7, %s331_s6  ;;  %p60_p4 = scmp.eq.s32.totalorder %s187_s11, 1 }
   0x9   : > { %s392_s15 = scalar_select %p41_p1, %s339_s8, %s43_s13  }
   0xa   : > { %p394_p5 = por %p54_p2, %p53_p0  ;;  %p398_p6 = por %p60_p4, %p59_p3 }
   0xb   : > { %p188_p7 = scmp.ge.s32.totalorder %s343_s9, 1  ;;  %p67_p8 = scmp.lt.s32.totalorder %s343_s9, 3 }
   0xc   : > { %p211_p9 = scmp.eq.s32.totalorder %s377_s10, 0  ;;  %s79_s20 = sshll.u32 %s440_s0, 4  ;;  %s80_s20 = int_to_ptr.hbm [resolvable:$true] %s79_s20 }
   0xd   : > { %p68_p10 = pnand %p188_p7, %p67_p8  ;;  %s345_s21 = smov [#allocation2]  }
   0xe   : > { %s81_s22 = sshll.u32 %s345_s21, 4  ;;  %s82_s22 = int_to_ptr.vmem [resolvable:$true] %s81_s22 }
   0xf   : > { %p203_p11 = pneg %p68_p10  ;;  %94 = sbr.rel (%p68_p10) target bundleno = 37 (0x25), region = 24 }
  0x11   : > { %p204_p12 = pnand %p211_p9, %p203_p11 }
  0x13   : > { %206 = dma.hbm_to_vmem [thread:$0]  (!%p204_p12), %s80_s20, 128, %s82_s22, [#allocation3]  }
  0x14   : > { %322 = dma.done.wait (%p211_p9), [#allocation3], 128  }
  0x15   : > { %324 = vsyncadd (%p211_p9), [#allocation3], 4294967168  ;;  %s107_s23 = sand.u32 1, %s335_s7   ;;  %s194_s24 = sshll.u32 %s377_s10, 3  ;;  %v110_v0 = vld [vmem:[#allocation2] sm:$0xff] }
  0x16   : > { %s192_s25 = sshll.u32 %s107_s23, 3  ;;  %s123_s28 = scalar_lea.hbm %s441_s1, %s194_s24 }
  0x17   : > { %s109_s29 = scalar_lea.vmem [#allocation5], %s192_s25  ;;  %s127_s2 = sshll.u32 %s123_s28, 4  ;;  %s128_s2 = int_to_ptr.hbm [resolvable:$true] %s127_s2 }
  0x18   : > { %s125_s30 = sshll.u32 %s109_s29, 4  ;;  %111 = vst [vmem:[%s109_s29] sm:$0xff] %v110_v0  ;;  %s113_s3 = scalar_lea.sflag [#allocation4], %s107_s23  ;;  %s126_s30 = int_to_ptr.vmem [resolvable:$true] %s125_s30 }
  0x19   : > { %s291_s4 = sshra.s32 %s128_s2, 4  ;;  %s297_s13 = scalar_lea.hbm %s441_s1, 16  ;;  %s292_s4 = int_to_ptr.hbm [resolvable:$true] %s291_s4 }
  0x1a   : > { %s293_s5 = scalar_lea.hbm %s292_s4, 8  ;;  %p298_p2 = scmp.lt.s32.totalorder %s292_s4, %s441_s1 }
  0x1b   : > { %p294_p13 = scmp.ne.s32.totalorder %s292_s4, %s293_s5  ;;  %p299_p3 = scmp.lt.s32.totalorder %s297_s13, %s293_s5 }
  0x1d   : > { %p295_p0 = pnand %p294_p13, %p394_p5  ;;  %p300_p4 = por %p299_p3, %p298_p2 }
  0x1f   : > { %p296_p1 = pneg %p295_p0 }
  0x21   : > { %p301_p7 = pnand %p300_p4, %p296_p1 }
  0x23   : > { %304 = shalt.err (!%p301_p7)
}
  0x24   : > { %201 = dma.vmem_to_hbm [thread:$0]  (%p394_p5), %s126_s30, 128, %s128_s2, %s113_s3  }
  0x25 PF: > { %p213_p8 = scmp.ge.s32.totalorder %s343_s9, 2  ;;  %s139_s19 = sand.u32 1, %s331_s6  }
  0x26   : > { %s140_s20 = scalar_lea.sflag [#allocation4], %s139_s19 }
  0x27   : > { %p208_p9 = pnand %p213_p8, %p398_p6 }
  0x29   : > { %p209_p10 = pneg %p208_p9 }
  0x2b   : > { %326 = dma.done.wait (%p209_p10), %s140_s20, 128  }
  0x2c   : > { %328 = vsyncadd (%p209_p10), %s140_s20, 4294967168  ;;  %p12_p11 = scmp.ge.s32.totalorder %s381_s12, 4   ;;  %s444_s6 = smov %s335_s7 }
  0x2d   : > { %s445_s7 = smov %s339_s8  ;;  %s446_s8 = smov %s392_s15 }
  0x2e   : > { %s447_s9 = smov %s381_s12  ;;  %14 = sbr.rel (!%p12_p11) target bundleno = 4 (0x4), region = 61 }
  0x33   :  { %146 = vsyncpa [#allocation3], 1 }
  0x34   :  { %148 = vsyncpa [#allocation3 + $0x1], 1 }
  0x35   :  { %149 = vsyncpa [#allocation4], 1 }
  0x36   :  { %151 = vsyncpa [#allocation4 + $0x1], 1 }

// kernel: tpu_custom_call.1
= control target key start
LH: loop header
LB: loop body
LE: loop exit
PB: predicated region body
PF: predicated region fallthrough
CT: control target
= control target key end

     0   :  { %16 = vsyncpa [#allocation3], 0  ;;  %s687_s0 = inlined_call_operand.hbm [shape: f32[16,32], index: 0, kind: input, shape index: {}]   ;;  %s688_s1 = inlined_call_operand.hbm [shape: bf16[32,32], index: 1, kind: input, shape index: {}]   ;;  %s689_s2 = inlined_call_operand.vmem [shape: f32[1,32], index: 2, kind: input, shape index: {}]   ;;  %s690_s3 = inlined_call_operand.hbm [shape: bf16[32,32], index: 3, kind: input, shape index: {}]   ;;  %s691_s4 = inlined_call_operand.vmem [shape: f32[1,32], index: 4, kind: input, shape index: {}]   ;;  %s692_s5 = inlined_call_operand.hbm [shape: bf16[32,32], index: 5, kind: input, shape index: {}]   ;;  %s693_s6 = inlined_call_operand.vmem [shape: f32[1,32], index: 6, kind: input, shape index: {}]   ;;  %s694_s7 = inlined_call_operand.vmem [shape: f32[1,32], index: 7, kind: input, shape index: {}]   ;;  %s695_s8 = inlined_call_operand.hbm [shape: bf16[16,32], index: 8, kind: output, shape index: {0}]   ;;  %s696_s9 = inlined_call_operand.hbm [shape: bf16[16,32], index: 9, kind: output, shape index: {1}]   ;;  %s697_s10 = inlined_call_operand.hbm [shape: bf16[16,32], index: 10, kind: output, shape index: {2}]  }
   0x1   :  { %17 = vsyncpa [#allocation6], 0 }
   0x2   :  { %18 = vsyncpa [#allocation9], 0 }
   0x3   :  { %19 = vsyncpa [#allocation4], 0  ;;  %s38_s15 = sshll.u32 %s688_s1, 4  ;;  %s39_s15 = int_to_ptr.hbm [resolvable:$true] %s38_s15 }
   0x4   :  { %20 = vsyncpa [#allocation12], 0  ;;  %s558_s16 = smov [#allocation5]   ;;  %s25_s20 = sshll.u32 %s687_s0, 4  ;;  %s26_s20 = int_to_ptr.hbm [resolvable:$true] %s25_s20 }
   0x5   :  { %s40_s17 = sshll.u32 %s558_s16, 4  ;;  %s559_s21 = smov 64   ;;  %s41_s17 = int_to_ptr.vmem [resolvable:$true] %s40_s17 }
   0x6   :  { %s560_s22 = smov 4   ;;  %s561_s23 = smov [#allocation2]  }
   0x7   :  { %46 = dma.hbm_to_vmem [thread:$0]  %s39_s15, 256, %s41_s17, [#allocation6], %s559_s21, %s559_s21, %s560_s22  }
   0x8   :  { %s27_s24 = sshll.u32 %s561_s23, 4  ;;  %s562_s1 = smov 128   ;;  %s28_s24 = int_to_ptr.vmem [resolvable:$true] %s27_s24 }
   0x9   :  { %s563_s25 = smov 8   ;;  %s53_s28 = sshll.u32 %s690_s3, 4  ;;  %s54_s28 = int_to_ptr.hbm [resolvable:$true] %s53_s28 }
   0xa   :  { %33 = dma.hbm_to_vmem [thread:$0]  %s26_s20, 256, %s28_s24, [#allocation3], %s562_s1, %s562_s1, %s563_s25  }
   0xb   :  { %s564_s29 = smov [#allocation7]   ;;  %s68_s12 = sshll.u32 %s692_s5, 4  ;;  %s69_s12 = int_to_ptr.hbm [resolvable:$true] %s68_s12 }
   0xc   :  { %s55_s0 = sshll.u32 %s564_s29, 4  ;;  %s565_s13 = smov [#allocation8]   ;;  %s56_s0 = int_to_ptr.vmem [resolvable:$true] %s55_s0 }
   0xd   :  { %61 = dma.hbm_to_vmem [thread:$0]  %s54_s28, 256, %s56_s0, [#allocation6], %s559_s21, %s559_s21, %s560_s22  }
   0xe   :  { %s70_s14 = sshll.u32 %s565_s13, 4  ;;  %s71_s14 = int_to_ptr.vmem [resolvable:$true] %s70_s14 }
   0xf   :  { %76 = dma.hbm_to_vmem [thread:$0]  %s69_s12, 256, %s71_s14, [#allocation9], %s559_s21, %s559_s21, %s560_s22  }
  0x10   :  { %548 = dma.done.wait [#allocation3], 256  }
  0x11   :  { %549 = vsyncadd [#allocation3], 4294967040 }
  0x12   :  { %550 = dma.done.wait [#allocation6], 512  }
  0x13   :  { %551 = vsyncadd [#allocation6], 4294966784 }
  0x14   :  { %552 = dma.done.wait [#allocation9], 256  }
  0x15   :  { %553 = vsyncadd [#allocation9], 4294967040  ;;  %v98_v0 = vld [vmem:[#allocation2] sm:$0xff]  ;;  %vm102_vm0 = vcmask 261120   ;;  %v99_v2 = vld [vmem:[#allocation2 + $0x8] sm:$0xff]  ;;  %v566_v6 = vmov 32.0  }
  0x16   :  { %v100_v1 = vmul.f32 %v98_v0, %v98_v0  ;;  %v101_v4 = vmul.f32 %v99_v2, %v99_v2  ;;  %374 = vrcp.f32 %v566_v6  ;;  %v353_v12 = vld [vmem:[#allocation5 + $0x8] sm:$0xff]  ;;  %v355_v13 = vld [vmem:[#allocation7 + $0x8] sm:$0xff]  ;;  %v352_v16 = vld [vmem:[#allocation5] sm:$0xff]  ;;  %vm190_vm8 = vcmask 257024   ;;  %s288_s24 = sshll.u32 %s696_s9, 4  ;;  %s568_s1 = smov [#allocation10]   ;;  %s289_s24 = int_to_ptr.hbm [resolvable:$true] %s288_s24 }
  0x17   :  { %v357_v14 = vld [vmem:[#allocation8 + $0x8] sm:$0xff]  ;;  %178 = vmatpush.bf16.msra.mxu0 %v353_v12  ;;  %219 = vmatpush.bf16.msra.mxu1 %v355_v13  ;;  %v354_v17 = vld [vmem:[#allocation7] sm:$0xff]  ;;  %v356_v18 = vld [vmem:[#allocation8] sm:$0xff]  ;;  %s275_s27 = sshll.u32 %s695_s8, 4  ;;  %s569_s9 = smov [#allocation13]   ;;  %s276_s27 = int_to_ptr.hbm [resolvable:$true] %s275_s27 }
  0x18   :  { %v103_v3 = vsel %vm102_vm0, %v100_v1, 0.0  ;;  %v106_v5 = vsel %vm102_vm0, %v101_v4, 0.0  ;;  %257 = vmatpush.bf16.msra.mxu2 %v357_v14  ;;  %v370_v39 = vld [vmem:[%s694_s7] ss:$0 sm:$0xff]  ;;  %s299_s8 = sshll.u32 %s569_s9, 4  ;;  %s301_s0 = sshll.u32 %s697_s10, 4  ;;  %s300_s8 = int_to_ptr.vmem [resolvable:$true] %s299_s8  ;;  %s302_s0 = int_to_ptr.hbm [resolvable:$true] %s301_s0 }
  0x19   :  { %104 = vadd.xlane.f32.xlu0 %v103_v3  ;;  %v371_v45 = vld [vmem:[%s689_s2] ss:$0 sm:$0xff]  ;;  %s567_s2 = smov [#allocation11]  }
  0x1a   :  { %v372_v46 = vld [vmem:[%s691_s4] ss:$0 sm:$0xff]  ;;  %s286_s4 = sshll.u32 %s567_s2, 4  ;;  %s287_s4 = int_to_ptr.vmem [resolvable:$true] %s286_s4 }
  0x1b   :  { %179 = vmatpush.bf16.msra.mxu0 %v352_v16  ;;  %220 = vmatpush.bf16.msra.mxu1 %v354_v17  ;;  %v373_v53 = vld [vmem:[%s693_s6] ss:$0 sm:$0xff]  ;;  %s273_s6 = sshll.u32 %s568_s1, 4  ;;  %s274_s6 = int_to_ptr.vmem [resolvable:$true] %s273_s6 }
  0x1c   :  { %v375_v7 = vpop.eup %374  ;;  %258 = vmatpush.bf16.msra.mxu2 %v356_v18 }
  0x1d   :  { %v110_v8 = vmul.f32 32.0, %v375_v7  ;;  %vm114_vm1 = vweird.f32 %v375_v7 }
  0x1f   :  { %v111_v9 = vsub.f32 1.0, %v110_v8 }
  0x21   :  { %107 = vadd.xlane.f32.xlu0 %v106_v5  ;;  %v112_v10 = vmul.f32 %v375_v7, %v111_v9 }
  0x23   :  { %v113_v11 = vadd.f32 %v375_v7, %v112_v10 }
  0x25   :  { %v115_v15 = vsel %vm114_vm1, %v375_v7, %v113_v11 }
  0x8c   :  { %v105_v19 = vpop.xlane.xlu0 %104 }
  0x8d   :  { %v116_v20 = vmul.f32 %v115_v15, %v105_v19 }
  0x8f   :  { %v118_v21 = vadd.f32 1e-05, %v116_v20 }
  0x91   :  { %376 = vrsqrt.f32 %v118_v21  ;;  %vm126_vm3 = vweird.f32 %v118_v21 }
  0x94   :  { %v108_v22 = vpop.xlane.xlu0 %107 }
  0x95   :  { %v117_v23 = vmul.f32 %v115_v15, %v108_v22 }
  0x97   :  { %v377_v24 = vpop.eup %376  ;;  %v119_v25 = vadd.f32 1e-05, %v117_v23 }
  0x98   :  { %v121_v26 = vmul.f32 %v377_v24, %v118_v21  ;;  %vm127_vm2 = vweird.f32 %v377_v24 }
  0x99   :  { %378 = vrsqrt.f32 %v119_v25  ;;  %vm128_vm4 = vmor %vm126_vm3, %vm127_vm2  ;;  %vm136_vm6 = vweird.f32 %v119_v25 }
  0x9a   :  { %v122_v27 = vmul.f32 %v377_v24, %v121_v26 }
  0x9c   :  { %v123_v28 = vmul.f32 0.5, %v122_v27 }
  0x9e   :  { %v124_v29 = vsub.f32 1.5, %v123_v28 }
  0x9f   :  { %v379_v30 = vpop.eup %378 }
  0xa0   :  { %v131_v31 = vmul.f32 %v379_v30, %v119_v25  ;;  %v125_v32 = vmul.f32 %v377_v24, %v124_v29  ;;  %vm137_vm5 = vweird.f32 %v379_v30 }
  0xa1   :  { %vm138_vm7 = vmor %vm136_vm6, %vm137_vm5 }
  0xa2   :  { %v132_v33 = vmul.f32 %v379_v30, %v131_v31  ;;  %v129_v35 = vsel %vm128_vm4, %v377_v24, %v125_v32 }
  0xa3   :  { %v140_v38 = vmul.f32 %v129_v35, %v98_v0 }
  0xa4   :  { %v133_v34 = vmul.f32 0.5, %v132_v33 }
  0xa5   :  { %v146_v42 = vmul.f32 %v370_v39, %v140_v38 }
  0xa6   :  { %v134_v36 = vsub.f32 1.5, %v133_v34 }
  0xa8   :  { %v135_v37 = vmul.f32 %v379_v30, %v134_v36 }
  0xaa   :  { %v139_v40 = vsel %vm138_vm7, %v379_v30, %v135_v37 }
  0xab   :  { %v141_v41 = vmul.f32 %v139_v40, %v99_v2 }
  0xad   :  { %v147_v43 = vmul.f32 %v370_v39, %v141_v41 }
  0xaf   :  { %v148_v44 = vpack.c.bf16 %v147_v43, %v146_v42 }
  0xb1   :  { %333 = vmatmul.msk.bf16.vlgmr.msra.gmra.mxu0 %vm102_vm0, %v148_v44  ;;  %342 = vmatmul.msk.bf16.vlgmr.msra.gmra.mxu1 %vm102_vm0, %v148_v44 }
  0xb2   :  { %351 = vmatmul.msk.bf16.vlgmr.msra.gmra.mxu2 %vm102_vm0, %v148_v44 }
 0x12e   :  { %v181_v47 = vpop.f32.mrf.mxu0  ;;  %v222_v48 = vpop.f32.mrf.mxu1 }
 0x12f   :  { %v182_v49 = vadd.f32 %v371_v45, %v181_v47  ;;  %v223_v50 = vadd.f32 %v372_v46, %v222_v48 }
 0x131   :  { %v186_v51 = vmul.f32 0.35355338, %v182_v49  ;;  %v227_v52 = vpack.c.bf16 %v223_v50, %v223_v50 }
 0x133   :  { %v188_v54 = vpack.c.bf16 %v186_v51, %v186_v51  ;;  %229 = vst.msk [vmem:[#allocation11] sm:$0xf] %vm190_vm8, %v227_v52 }
 0x135   :  { %191 = vst.msk [vmem:[#allocation10] sm:$0xf] %vm190_vm8, %v188_v54  ;;  %v260_v55 = vpop.f32.mrf.mxu2 }
 0x136   :  { %v261_v56 = vadd.f32 %v373_v53, %v260_v55  ;;  %v183_v57 = vpop.f32.mrf.mxu0  ;;  %v224_v58 = vpop.f32.mrf.mxu1 }
 0x137   :  { %v184_v59 = vadd.f32 %v371_v45, %v183_v57  ;;  %v225_v60 = vadd.f32 %v372_v46, %v224_v58 }
 0x138   :  { %v265_v61 = vpack.c.bf16 %v261_v56, %v261_v56 }
 0x139   :  { %v187_v62 = vmul.f32 0.35355338, %v184_v59  ;;  %v228_v63 = vpack.c.bf16 %v225_v60, %v225_v60 }
 0x13a   :  { %267 = vst.msk [vmem:[#allocation13] sm:$0xf] %vm190_vm8, %v265_v61 }
 0x13b   :  { %v189_v0 = vpack.c.bf16 %v187_v62, %v187_v62  ;;  %230 = vst.msk [vmem:[#allocation11 + $0x4] sm:$0xf] %vm190_vm8, %v228_v63 }
 0x13c   :  { %294 = dma.vmem_to_hbm [thread:$0]  %s287_s4, 128, %s289_s24, [#allocation12], %s559_s21, %s559_s21, %s560_s22  }
 0x13d   :  { %192 = vst.msk [vmem:[#allocation10 + $0x4] sm:$0xf] %vm190_vm8, %v189_v0  ;;  %v262_v1 = vpop.f32.mrf.mxu2 }
 0x13e   :  { %v263_v2 = vadd.f32 %v373_v53, %v262_v1  ;;  %281 = dma.vmem_to_hbm [thread:$0]  %s274_s6, 128, %s276_s27, [#allocation4], %s559_s21, %s559_s21, %s560_s22  }
 0x140   :  { %v266_v3 = vpack.c.bf16 %v263_v2, %v263_v2 }
 0x142   :  { %268 = vst.msk [vmem:[#allocation13 + $0x4] sm:$0xf] %vm190_vm8, %v266_v3 }
 0x143   :  { %307 = dma.vmem_to_hbm [thread:$0]  %s300_s8, 128, %s302_s0, [#allocation12], %s559_s21, %s559_s21, %s560_s22  }
 0x144   :  { %554 = dma.done.wait [#allocation4], 128  }
 0x145   :  { %555 = vsyncadd [#allocation4], 4294967168 }
 0x146   :  { %556 = dma.done.wait [#allocation12], 256  }
 0x147   :  { %557 = vsyncadd [#allocation12], 4294967040 }
 0x148   :  { %320 = vsyncpa [#allocation3], 1 }
 0x149   :  { %321 = vsyncpa [#allocation6], 1 }
 0x14a   :  { %322 = vsyncpa [#allocation9], 1 }
 0x14b   :  { %323 = vsyncpa [#allocation4], 1 }
 0x14c   :  { %324 = vsyncpa [#allocation12], 1 }

</bundles_post_ra>
